<compile_context>
chip_gen: v6e
topology: v6e:2x2x1
jax: 0.10.0
libtpu: 0.0.40
codegen_flags: <defaults>
</compile_context>

<pallas_src>
import jax
import jax.numpy as jnp
from jax import lax
from jax.experimental import pallas as pl
from jax.experimental.pallas import tpu as pltpu


def _round_up(n, m):
    return ((n + m - 1) // m) * m


def mlp_kernel(x_ref,
               w1_ref, b1_ref,
               w2_ref, b2_ref,
               w3_ref, b3_ref,
               w4_ref, b4_ref,
               o_ref):
    """Fused MLP forward on one batch tile.

    x_ref : (TILE_B, n_in)   -- native batch-major layout, streamed
    w*_ref: (out, in)        -- PyTorch nn.Linear orientation
    b*_ref: (out, 1)         -- broadcasts across lanes (batch)
    o_ref : (n_out, TILE_B)  -- lane-dense (batch on lanes) output
    """
    # linear1 + sigmoid: contract both operands on their n_in axis so the
    # result is already feature-major (10, TILE_B) -- no wrapper transpose.
    h = lax.dot_general(
        w1_ref[...], x_ref[...],
        dimension_numbers=(((1,), (1,)), ((), ())),
        preferred_element_type=jnp.float32) + b1_ref[...]
    h = jax.nn.sigmoid(h)

    # linear2 + sigmoid
    h = jnp.dot(w2_ref[...], h, preferred_element_type=jnp.float32) + b2_ref[...]
    h = jax.nn.sigmoid(h)

    # linear3 + relu
    h = jnp.dot(w3_ref[...], h, preferred_element_type=jnp.float32) + b3_ref[...]
    h = jnp.maximum(h, 0.0)

    # output (no activation)
    o_ref[...] = (jnp.dot(w4_ref[...], h, preferred_element_type=jnp.float32)
                  + b4_ref[...]).astype(o_ref.dtype)


# Conservative VMEM budget: v7x has only 64 MiB per TensorCore.
_VMEM_BUDGET = 48 * 1024 * 1024


def _max_tile_for_vmem(n_out):
    """Largest batch tile whose double-buffered residency fits the budget."""
    n_out_p = _round_up(n_out, 8)
    # Worst-case bytes per batch element (assumes the narrow x window is
    # lane-padded to 128 inside VMEM):
    #   x window    : 2 buffers * 128 lanes * 4 B
    #   out window  : 2 buffers * n_out_p sublanes * 4 B
    #   temporaries : xT + h1 + h2 + h3 + out (sublane padded), f32
    per_elem = 2 * 128 * 4 + 2 * n_out_p * 4 + (16 + 16 + 16 + 8 + n_out_p) * 4
    reserve = 4 * 1024 * 1024  # headroom for Mosaic internal scratch
    return max(128, ((_VMEM_BUDGET - reserve) // per_elem) // 128 * 128)


def mlp_forward(x, params, tile_b=32768, batch_major_output=True):
    """x: (batch, num_inputs) f32 -> (batch, num_outputs) f32.

    Pass batch_major_output=False to receive the kernel-native
    (num_outputs, batch) layout and skip the final (small) transpose.
    """
    (w1, b1), (w2, b2), (w3, b3), (w4, b4) = params
    batch, n_in = x.shape
    n_out = w4.shape[0]

    # Lane-aligned batch tile:
    #  * always a multiple of 128 (lane constraint), regardless of caller input
    #  * capped so there are >= 2 grid steps when possible (v7x: 2 TensorCores
    #    share the "parallel" grid axis)
    #  * capped so double-buffered VMEM residency fits every TPU generation
    tile_b = _round_up(max(int(tile_b), 1), 128)
    tile_b = min(tile_b, _round_up(pl.cdiv(max(batch, 1), 2), 128))
    tile_b = min(tile_b, _max_tile_for_vmem(n_out))
    grid_b = pl.cdiv(batch, tile_b)

    const_map = lambda i: (0, 0)
    in_specs = [
        # Streamed x tile in native layout (no wrapper pad / transpose).
        # Last dim = n_in = full array dim, so the (8,128) rule is satisfied;
        # the partial last block is handled by Pallas masking.
        pl.BlockSpec((tile_b, n_in), lambda i: (i, 0)),
        pl.BlockSpec(w1.shape, const_map), pl.BlockSpec(b1.shape, const_map),
        pl.BlockSpec(w2.shape, const_map), pl.BlockSpec(b2.shape, const_map),
        pl.BlockSpec(w3.shape, const_map), pl.BlockSpec(b3.shape, const_map),
        pl.BlockSpec(w4.shape, const_map), pl.BlockSpec(b4.shape, const_map),
    ]
    out_spec = pl.BlockSpec((n_out, tile_b), lambda i: (0, i))

    out_t = pl.pallas_call(
        mlp_kernel,
        out_shape=jax.ShapeDtypeStruct((n_out, batch), jnp.float32),
        grid=(grid_b,),
        in_specs=in_specs,
        out_specs=out_spec,
        compiler_params=pltpu.CompilerParams(
            dimension_semantics=("parallel",),
            vmem_limit_bytes=_VMEM_BUDGET,
        ),
    )(x, w1, b1, w2, b2, w3, b3, w4, b4)

    return out_t.T if batch_major_output else out_t


def init_params(key, num_inputs, num_outputs):
    """Deterministic init mimicking nn.Linear default (uniform +/- 1/sqrt(fan_in)).

    Weights are stored in PyTorch orientation (out, in); biases as (out, 1)
    so they broadcast across the lane (batch) axis inside the kernel.
    """
    dims = [num_inputs, 10, 15, 5, num_outputs]
    params = []
    for i in range(4):
        fan_in, fan_out = dims[i], dims[i + 1]
        key, kw, kb = jax.random.split(key, 3)
        bound = 1.0 / jnp.sqrt(jnp.float32(fan_in))
        w = jax.random.uniform(kw, (fan_out, fan_in), jnp.float32, -bound, bound)
        b = jax.random.uniform(kb, (fan_out, 1), jnp.float32, -bound, bound)
        params.append((w, b))
    return params


def mlp_reference(x, params):
    """Pure-JAX reference for correctness check (batch-major layout)."""
    (w1, b1), (w2, b2), (w3, b3), (w4, b4) = params
    h = jax.nn.sigmoid(x @ w1.T + b1.T)
    h = jax.nn.sigmoid(h @ w2.T + b2.T)
    h = jnp.maximum(h @ w3.T + b3.T, 0.0)
    return h @ w4.T + b4.T


if __name__ == "__main__":
    key = jax.random.PRNGKey(0)
    batch, num_inputs, num_outputs = 8, 16, 4

    kx, kp = jax.random.split(key)
    x = jax.random.normal(kx, (batch, num_inputs), jnp.float32)
    params = init_params(kp, num_inputs, num_outputs)

    out = jax.block_until_ready(mlp_forward(x, params))
    ref = mlp_reference(x, params)
    assert out.shape == (batch, num_outputs)
    assert jnp.allclose(out, ref, atol=1e-5, rtol=1e-5)

    # Multi-tile grid with a non-multiple-of-128 remainder (masked last block).
    kx2 = jax.random.fold_in(kx, 1)
    x2 = jax.random.normal(kx2, (300, num_inputs), jnp.float32)
    out2 = jax.block_until_ready(mlp_forward(x2, params, tile_b=256))
    assert jnp.allclose(out2, mlp_reference(x2, params), atol=1e-5, rtol=1e-5)

    # EELS-typical single input feature (num_inputs=1).
    params3 = init_params(jax.random.fold_in(kp, 2), 1, num_outputs)
    x3 = jax.random.normal(jax.random.fold_in(kx, 2), (40, 1), jnp.float32)
    out3 = jax.block_until_ready(mlp_forward(x3, params3))
    assert jnp.allclose(out3, mlp_reference(x3, params3), atol=1e-5, rtol=1e-5)

    print("KERNEL_OK")
</pallas_src>

<mosaic_0001>
module attributes {stable_mosaic.version = 11 : i64} {
  func.func @mlp_kernel(%arg0: i32, %arg1: memref<128x16xf32, #tpu.memory_space<vmem>>, %arg2: memref<10x16xf32, #tpu.memory_space<vmem>>, %arg3: memref<10x1xf32, #tpu.memory_space<vmem>>, %arg4: memref<15x10xf32, #tpu.memory_space<vmem>>, %arg5: memref<15x1xf32, #tpu.memory_space<vmem>>, %arg6: memref<5x15xf32, #tpu.memory_space<vmem>>, %arg7: memref<5x1xf32, #tpu.memory_space<vmem>>, %arg8: memref<4x5xf32, #tpu.memory_space<vmem>>, %arg9: memref<4x1xf32, #tpu.memory_space<vmem>>, %arg10: memref<4x128xf32, #tpu.memory_space<vmem>>) attributes {dimension_semantics = [#tpu.dimension_semantics<parallel>], iteration_bounds = array<i64: 1>, scalar_prefetch = 0 : i64, scratch_operands = 0 : i64, tpu.core_type = #tpu.core_type<tc>, window_params = [{transform_indices = @transform_0, window_bounds = array<i64: 128, 16>}, {pipeline_mode = #tpu.pipeline_mode<synchronous>, transform_indices = @transform_1, window_bounds = array<i64: 10, 16>}, {pipeline_mode = #tpu.pipeline_mode<synchronous>, transform_indices = @transform_2, window_bounds = array<i64: 10, 1>}, {pipeline_mode = #tpu.pipeline_mode<synchronous>, transform_indices = @transform_3, window_bounds = array<i64: 15, 10>}, {pipeline_mode = #tpu.pipeline_mode<synchronous>, transform_indices = @transform_4, window_bounds = array<i64: 15, 1>}, {pipeline_mode = #tpu.pipeline_mode<synchronous>, transform_indices = @transform_5, window_bounds = array<i64: 5, 15>}, {pipeline_mode = #tpu.pipeline_mode<synchronous>, transform_indices = @transform_6, window_bounds = array<i64: 5, 1>}, {pipeline_mode = #tpu.pipeline_mode<synchronous>, transform_indices = @transform_7, window_bounds = array<i64: 4, 5>}, {pipeline_mode = #tpu.pipeline_mode<synchronous>, transform_indices = @transform_8, window_bounds = array<i64: 4, 1>}, {transform_indices = @transform_9, window_bounds = array<i64: 4, 128>}]} {
    %c0 = arith.constant 0 : index
    %c0_0 = arith.constant 0 : index
    %0 = vector.load %arg2[%c0, %c0_0] : memref<10x16xf32, #tpu.memory_space<vmem>>, vector<10x16xf32>
    %c0_1 = arith.constant 0 : index
    %c0_2 = arith.constant 0 : index
    %1 = vector.load %arg1[%c0_1, %c0_2] : memref<128x16xf32, #tpu.memory_space<vmem>>, vector<128x16xf32>
    %cst = arith.constant dense<0.000000e+00> : vector<10x128xf32>
    %2 = tpu.matmul %0, %1, %cst {dimension_numbers = #tpu.dot_dimension_numbers<[1], [1], [0], [0], [0, 0, 1, 0], [], []>} : vector<10x16xf32>, vector<128x16xf32>, vector<10x128xf32> -> vector<10x128xf32>
    %c0_3 = arith.constant 0 : index
    %c0_4 = arith.constant 0 : index
    %3 = vector.load %arg3[%c0_3, %c0_4] : memref<10x1xf32, #tpu.memory_space<vmem>>, vector<10x1xf32>
    %4 = vector.broadcast %3 : vector<10x1xf32> to vector<10x128xf32>
    %5 = arith.addf %2, %4 : vector<10x128xf32>
    %6 = arith.negf %5 : vector<10x128xf32>
    %7 = math.exp %6 : vector<10x128xf32>
    %cst_5 = arith.constant 1.000000e+00 : f32
    %8 = vector.broadcast %cst_5 : f32 to vector<10x128xf32>
    %9 = arith.addf %8, %7 : vector<10x128xf32>
    %10 = arith.divf %8, %9 : vector<10x128xf32>
    %c0_6 = arith.constant 0 : index
    %c0_7 = arith.constant 0 : index
    %11 = vector.load %arg4[%c0_6, %c0_7] : memref<15x10xf32, #tpu.memory_space<vmem>>, vector<15x10xf32>
    %cst_8 = arith.constant dense<0.000000e+00> : vector<15x128xf32>
    %12 = tpu.matmul %11, %10, %cst_8 {dimension_numbers = #tpu.dot_dimension_numbers<[1], [0], [0], [1], [0, 0, 1, 1], [], []>} : vector<15x10xf32>, vector<10x128xf32>, vector<15x128xf32> -> vector<15x128xf32>
    %c0_9 = arith.constant 0 : index
    %c0_10 = arith.constant 0 : index
    %13 = vector.load %arg5[%c0_9, %c0_10] : memref<15x1xf32, #tpu.memory_space<vmem>>, vector<15x1xf32>
    %14 = vector.broadcast %13 : vector<15x1xf32> to vector<15x128xf32>
    %15 = arith.addf %12, %14 : vector<15x128xf32>
    %16 = arith.negf %15 : vector<15x128xf32>
    %17 = math.exp %16 : vector<15x128xf32>
    %cst_11 = arith.constant 1.000000e+00 : f32
    %18 = vector.broadcast %cst_11 : f32 to vector<15x128xf32>
    %19 = arith.addf %18, %17 : vector<15x128xf32>
    %20 = arith.divf %18, %19 : vector<15x128xf32>
    %c0_12 = arith.constant 0 : index
    %c0_13 = arith.constant 0 : index
    %21 = vector.load %arg6[%c0_12, %c0_13] : memref<5x15xf32, #tpu.memory_space<vmem>>, vector<5x15xf32>
    %cst_14 = arith.constant dense<0.000000e+00> : vector<5x128xf32>
    %22 = tpu.matmul %21, %20, %cst_14 {dimension_numbers = #tpu.dot_dimension_numbers<[1], [0], [0], [1], [0, 0, 1, 1], [], []>} : vector<5x15xf32>, vector<15x128xf32>, vector<5x128xf32> -> vector<5x128xf32>
    %c0_15 = arith.constant 0 : index
    %c0_16 = arith.constant 0 : index
    %23 = vector.load %arg7[%c0_15, %c0_16] : memref<5x1xf32, #tpu.memory_space<vmem>>, vector<5x1xf32>
    %24 = vector.broadcast %23 : vector<5x1xf32> to vector<5x128xf32>
    %25 = arith.addf %22, %24 : vector<5x128xf32>
    %cst_17 = arith.constant 0.000000e+00 : f32
    %26 = vector.broadcast %cst_17 : f32 to vector<5x128xf32>
    %27 = arith.maximumf %25, %26 : vector<5x128xf32>
    %c0_18 = arith.constant 0 : index
    %c0_19 = arith.constant 0 : index
    %28 = vector.load %arg8[%c0_18, %c0_19] : memref<4x5xf32, #tpu.memory_space<vmem>>, vector<4x5xf32>
    %cst_20 = arith.constant dense<0.000000e+00> : vector<4x128xf32>
    %29 = tpu.matmul %28, %27, %cst_20 {dimension_numbers = #tpu.dot_dimension_numbers<[1], [0], [0], [1], [0, 0, 1, 1], [], []>} : vector<4x5xf32>, vector<5x128xf32>, vector<4x128xf32> -> vector<4x128xf32>
    %c0_21 = arith.constant 0 : index
    %c0_22 = arith.constant 0 : index
    %30 = vector.load %arg9[%c0_21, %c0_22] : memref<4x1xf32, #tpu.memory_space<vmem>>, vector<4x1xf32>
    %31 = vector.broadcast %30 : vector<4x1xf32> to vector<4x128xf32>
    %32 = arith.addf %29, %31 : vector<4x128xf32>
    %c0_23 = arith.constant 0 : index
    %c0_24 = arith.constant 0 : index
    %33 = vector.load %arg10[%c0_23, %c0_24] : memref<4x128xf32, #tpu.memory_space<vmem>>, vector<4x128xf32>
    tpu.vector_store %arg10[%c0_23, %c0_24], %32 {strides = array<i32>} : memref<4x128xf32, #tpu.memory_space<vmem>>, vector<4x128xf32>,
    return
  }
  func.func @transform_0(%arg0: i32) -> (i32, i32) {
    %c0_i32 = arith.constant 0 : i32
    %c0_i32_0 = arith.constant 0 : i32
    return %arg0, %c0_i32 : i32, i32
  }
  func.func @transform_1(%arg0: i32) -> (i32, i32) {
    %c0_i32 = arith.constant 0 : i32
    %c0_i32_0 = arith.constant 0 : i32
    %c0_i32_1 = arith.constant 0 : i32
    return %c0_i32, %c0_i32_0 : i32, i32
  }
  func.func @transform_2(%arg0: i32) -> (i32, i32) {
    %c0_i32 = arith.constant 0 : i32
    %c0_i32_0 = arith.constant 0 : i32
    %c0_i32_1 = arith.constant 0 : i32
    return %c0_i32, %c0_i32_0 : i32, i32
  }
  func.func @transform_3(%arg0: i32) -> (i32, i32) {
    %c0_i32 = arith.constant 0 : i32
    %c0_i32_0 = arith.constant 0 : i32
    %c0_i32_1 = arith.constant 0 : i32
    return %c0_i32, %c0_i32_0 : i32, i32
  }
  func.func @transform_4(%arg0: i32) -> (i32, i32) {
    %c0_i32 = arith.constant 0 : i32
    %c0_i32_0 = arith.constant 0 : i32
    %c0_i32_1 = arith.constant 0 : i32
    return %c0_i32, %c0_i32_0 : i32, i32
  }
  func.func @transform_5(%arg0: i32) -> (i32, i32) {
    %c0_i32 = arith.constant 0 : i32
    %c0_i32_0 = arith.constant 0 : i32
    %c0_i32_1 = arith.constant 0 : i32
    return %c0_i32, %c0_i32_0 : i32, i32
  }
  func.func @transform_6(%arg0: i32) -> (i32, i32) {
    %c0_i32 = arith.constant 0 : i32
    %c0_i32_0 = arith.constant 0 : i32
    %c0_i32_1 = arith.constant 0 : i32
    return %c0_i32, %c0_i32_0 : i32, i32
  }
  func.func @transform_7(%arg0: i32) -> (i32, i32) {
    %c0_i32 = arith.constant 0 : i32
    %c0_i32_0 = arith.constant 0 : i32
    %c0_i32_1 = arith.constant 0 : i32
    return %c0_i32, %c0_i32_0 : i32, i32
  }
  func.func @transform_8(%arg0: i32) -> (i32, i32) {
    %c0_i32 = arith.constant 0 : i32
    %c0_i32_0 = arith.constant 0 : i32
    %c0_i32_1 = arith.constant 0 : i32
    return %c0_i32, %c0_i32_0 : i32, i32
  }
  func.func @transform_9(%arg0: i32) -> (i32, i32) {
    %c0_i32 = arith.constant 0 : i32
    %c0_i32_0 = arith.constant 0 : i32
    return %c0_i32, %arg0 : i32, i32
  }
}

</mosaic_0001>

<bundles_post_ra>
// kernel: tpu_custom_call.1
= control target key start
LH: loop header
LB: loop body
LE: loop exit
PB: predicated region body
PF: predicated region fallthrough
CT: control target
= control target key end

     0   :  { %vm63_vm0 = vcmask 130048   ;;  %v657_v2 = vmov 0   ;;  %s836_s0 = inlined_call_operand.vmem [shape: f32[8,16], index: 0, kind: input, shape index: {}]   ;;  %s837_s1 = inlined_call_operand.vmem [shape: f32[10,16], index: 1, kind: input, shape index: {}]   ;;  %s838_s2 = inlined_call_operand.vmem [shape: f32[10,1], index: 2, kind: input, shape index: {}]   ;;  %s839_s3 = inlined_call_operand.vmem [shape: f32[15,10], index: 3, kind: input, shape index: {}]   ;;  %s840_s4 = inlined_call_operand.vmem [shape: f32[15,1], index: 4, kind: input, shape index: {}]   ;;  %s841_s5 = inlined_call_operand.vmem [shape: f32[5,15], index: 5, kind: input, shape index: {}]   ;;  %s842_s6 = inlined_call_operand.vmem [shape: f32[5,1], index: 6, kind: input, shape index: {}]   ;;  %s843_s7 = inlined_call_operand.vmem [shape: f32[4,5], index: 7, kind: input, shape index: {}]   ;;  %s844_s8 = inlined_call_operand.vmem [shape: f32[4,1], index: 8, kind: input, shape index: {}]   ;;  %s845_s9 = inlined_call_operand.hbm [shape: f32[4,8], index: 9, kind: output, shape index: {}]  }
   0x1   :  { %v50_v0 = vld [vmem:[%s836_s0 + $0x78] sm:$0xff]  ;;  %v49_v1 = vld [vmem:[%s836_s0 + $0x70] sm:$0xff]  ;;  %617 = vset.pattern.permute.xlu0 %v657_v2  ;;  %618 = vset.pattern.permute.xlu1 %v657_v2  ;;  %v48_v3 = vld [vmem:[%s836_s0 + $0x68] sm:$0xff] }
   0x2   :  { %559 = vmatprep.subr.msk.mxu0 %vm63_vm0, %v50_v0  ;;  %v33_v4 = vld [vmem:[%s837_s1] sm:$0xff]  ;;  %v52_v5 = vld [vmem:[%s838_s2 + $0x8] sm:$0x3] }
   0x3   :  { %560 = vmatpush3.xpose.msk.msra.mxu0 %vm63_vm0, %v50_v0  ;;  %591 = vmatprep.mubr.msk.f32.mxu0 %vm63_vm0, %v33_v4 }
   0x4   :  { %561 = vmatprep.subr.msk.mxu0 %vm63_vm0, %v49_v1  ;;  %60 = vperm.xlu0 %617, %v52_v5  }
   0x7   :  { %562 = vmatpush3.xpose.msk.msra.mxu0 %vm63_vm0, %v49_v1 }
   0x8   :  { %563 = vmatprep.subr.msk.mxu0 %vm63_vm0, %v48_v3 }
   0x9   :  { %14 = vsyncpa [#allocation3], 0  ;;  %v47_v6 = vld [vmem:[%s836_s0 + $0x60] sm:$0xff]  ;;  %v46_v8 = vld [vmem:[%s836_s0 + $0x58] sm:$0xff]  ;;  %vm219_vm1 = vcmask 80896   ;;  %vm226_vm2 = vcmask 1041408  }
   0xa   :  { %v51_v7 = vld [vmem:[%s838_s2] sm:$0xff]  ;;  %v45_v10 = vld [vmem:[%s836_s0 + $0x50] sm:$0xff]  ;;  %v44_v11 = vld [vmem:[%s836_s0 + $0x48] sm:$0xff]  ;;  %v658_v41 = vmov 0.0   ;;  %vm659_vm3 = vmmov 0   ;;  %vm328_vm4 = vcmask 1046528  }
   0xb   :  { %564 = vmatpush3.xpose.msk.msra.mxu0 %vm63_vm0, %v48_v3  ;;  %55 = vperm.xlu0 %617, %v51_v7   ;;  %v318_v9 = vld [vmem:[%s842_s6] sm:$0x1f]  ;;  %v42_v13 = vld [vmem:[%s836_s0 + $0x38] sm:$0xff]  ;;  %v41_v14 = vld [vmem:[%s836_s0 + $0x30] sm:$0xff]  ;;  %vm324_vm5 = vcmask 121856   ;;  %vm414_vm6 = vcmask 1044480  }
   0xc   :  { %565 = vmatprep.subr.msk.mxu0 %vm63_vm0, %v47_v6  ;;  %v43_v12 = vld [vmem:[%s836_s0 + $0x40] sm:$0xff]  ;;  %v40_v15 = vld [vmem:[%s836_s0 + $0x28] sm:$0xff]  ;;  %v38_v17 = vld [vmem:[%s836_s0 + $0x18] sm:$0xff]  ;;  %vm410_vm7 = vcmask 39936  }
   0xd   :  { %v39_v16 = vld [vmem:[%s836_s0 + $0x20] sm:$0xff]  ;;  %v37_v18 = vld [vmem:[%s836_s0 + $0x10] sm:$0xff]  ;;  %v36_v19 = vld [vmem:[%s836_s0 + $0x8] sm:$0xff] }
   0xe   :  { %v35_v20 = vld [vmem:[%s836_s0] sm:$0xff]  ;;  %v34_v21 = vld [vmem:[%s837_s1 + $0x8] sm:$0x3] }
   0xf   :  { %566 = vmatpush3.xpose.msk.msra.mxu0 %vm63_vm0, %v47_v6  ;;  %321 = vperm.xlu0 %617, %v318_v9   ;;  %v205_v22 = vld [vmem:[%s839_s3] sm:$0xff]  ;;  %v208_v23 = vld [vmem:[%s840_s4 + $0x8] sm:$0x7f] }
  0x10   :  { %567 = vmatprep.subr.msk.mxu0 %vm63_vm0, %v46_v8  ;;  %598 = vmatprep.mubr.msk.f32.mxu1 %vm219_vm1, %v205_v22  ;;  %v207_v24 = vld [vmem:[%s840_s4] sm:$0xff]  ;;  %v206_v40 = vld [vmem:[%s839_s3 + $0x8] sm:$0x7f] }
  0x11   :  { %216 = vperm.xlu1 %618, %v208_v23   ;;  %v404_v25 = vld [vmem:[%s844_s8] sm:$0xf] }
  0x12   :  { %v317_v55 = vld [vmem:[%s841_s5] sm:$0x1f]  ;;  %s660_s5 = smov [#allocation2]  }
  0x13   :  { %568 = vmatpush3.xpose.msk.msra.mxu0 %vm63_vm0, %v46_v8  ;;  %v403_v62 = vld [vmem:[%s843_s7] sm:$0xf]  ;;  %s495_s14 = sshll.u32 %s660_s5, 4  ;;  %s496_s14 = int_to_ptr.vmem [resolvable:$true] %s495_s14 }
  0x14   :  { %569 = vmatprep.subr.msk.mxu0 %vm63_vm0, %v45_v10  ;;  %s635_s15 = scalar_lea.vmem %s496_s14, 64  ;;  %p640_p1 = scmp.lt.s32.totalorder %s496_s14, %s496_s14 }
  0x15   :  { %211 = vperm.xlu1 %618, %v207_v24   ;;  %p636_p0 = scmp.ne.s32.totalorder %s496_s14, %s635_s15  ;;  %p641_p2 = scmp.lt.s32.totalorder %s635_s15, %s635_s15 }
  0x17   :  { %570 = vmatpush3.xpose.msk.msra.mxu0 %vm63_vm0, %v45_v10  ;;  %p642_p3 = por %p641_p2, %p640_p1 }
  0x18   :  { %571 = vmatprep.subr.msk.mxu0 %vm63_vm0, %v44_v11 }
  0x19   :  { %407 = vperm.xlu1 %618, %v404_v25   ;;  %p643_p4 = pnand %p642_p3, %p636_p0 }
  0x1b   :  { %572 = vmatpush3.xpose.msk.msra.mxu0 %vm63_vm0, %v44_v11 }
  0x1c   :  { %573 = vmatprep.subr.msk.mxu0 %vm63_vm0, %v43_v12 }
  0x1f   :  { %574 = vmatpush3.xpose.msk.msra.mxu0 %vm63_vm0, %v43_v12 }
  0x20   :  { %575 = vmatprep.subr.msk.mxu0 %vm63_vm0, %v42_v13 }
  0x23   :  { %576 = vmatpush3.xpose.msk.msra.mxu0 %vm63_vm0, %v42_v13 }
  0x24   :  { %577 = vmatprep.subr.msk.mxu0 %vm63_vm0, %v41_v14 }
  0x27   :  { %578 = vmatpush3.xpose.msk.msra.mxu0 %vm63_vm0, %v41_v14 }
  0x28   :  { %579 = vmatprep.subr.msk.mxu0 %vm63_vm0, %v40_v15 }
  0x2b   :  { %580 = vmatpush3.xpose.msk.msra.mxu0 %vm63_vm0, %v40_v15 }
  0x2c   :  { %581 = vmatprep.subr.msk.mxu0 %vm63_vm0, %v39_v16 }
  0x2f   :  { %582 = vmatpush3.xpose.msk.msra.mxu0 %vm63_vm0, %v39_v16 }
  0x30   :  { %583 = vmatprep.subr.msk.mxu0 %vm63_vm0, %v38_v17 }
  0x33   :  { %584 = vmatpush3.xpose.msk.msra.mxu0 %vm63_vm0, %v38_v17 }
  0x34   :  { %585 = vmatprep.subr.msk.mxu0 %vm63_vm0, %v37_v18 }
  0x37   :  { %586 = vmatpush3.xpose.msk.msra.mxu0 %vm63_vm0, %v37_v18 }
  0x38   :  { %587 = vmatprep.subr.msk.mxu0 %vm63_vm0, %v36_v19 }
  0x3b   :  { %588 = vmatpush3.xpose.msk.msra.mxu0 %vm63_vm0, %v36_v19 }
  0x3c   :  { %589 = vmatprep.subr.msk.mxu0 %vm63_vm0, %v35_v20 }
  0x3f   :  { %590 = vmatpush3.xpose.msk.msra.mxu0 %vm63_vm0, %v35_v20 }
  0x42   :  { %592 = vmatmul.mubr.msk.f32.vlgmr.msra.gmra.mxu0 %vm63_vm0, %v34_v21 }
  0x7f   :  { %v61_v26 = vpop.permute.xlu0 %60 }
  0x86   :  { %v56_v29 = vpop.permute.xlu0 %55 }
  0x8a   :  { %v322_v57 = vpop.permute.xlu0 %321 }
  0x8c   :  { %v217_v42 = vpop.permute.xlu1 %216 }
  0x90   :  { %v212_v45 = vpop.permute.xlu1 %211 }
  0x94   :  { %v408_v63 = vpop.permute.xlu1 %407 }
 0x102   :  { %v593_v27 = vpop.f32.mrf.mxu0 }
 0x103   :  { %v190_v28 = vadd.f32 %v593_v27, %v61_v26 }
 0x104   :  { %v184_v30 = vpop.f32.mrf.mxu0 }
 0x105   :  { %v522_v31 = vmul.f32 -1.442695, %v190_v28  ;;  %v185_v32 = vadd.f32 %v184_v30, %v56_v29 }
 0x107   :  { %619 = vpow2.f32 %v522_v31  ;;  %v521_v33 = vmul.f32 -1.442695, %v185_v32 }
 0x109   :  { %621 = vpow2.f32 %v521_v33 }
 0x114   :  { %v620_v34 = vpop.eup %619 }
 0x115   :  { %v200_v35 = vadd.f32 1.0, %v620_v34 }
 0x116   :  { %v622_v36 = vpop.eup %621 }
 0x117   :  { %623 = vrcp.f32 %v200_v35  ;;  %v199_v37 = vadd.f32 1.0, %v622_v36 }
 0x119   :  { %625 = vrcp.f32 %v199_v37 }
 0x124   :  { %v624_v38 = vpop.eup %623 }
 0x125   :  { %594 = vmatprep.subr.msk.mxu1 %vm226_vm2, %v624_v38 }
 0x126   :  { %v626_v39 = vpop.eup %625  ;;  %595 = vmatpush3.msk.msra.mxu1 %vm226_vm2, %v624_v38 }
 0x127   :  { %596 = vmatprep.subr.mxu1 %v626_v39 }
 0x128   :  { %597 = vmatpush3.msra.mxu1 %v626_v39 }
 0x129   :  { %599 = vmatmul.mubr.msk.f32.vlgmr.msra.gmra.mxu1 %vm219_vm1, %v206_v40  ;;  %601 = vmatprep.subr.mxu1 %v658_v41 }
 0x12a   :  { %605 = vmatprep.mubr.msk.f32.mxu1 %vm659_vm3, %v658_v41 }
 0x1e9   :  { %v600_v43 = vpop.f32.mrf.mxu1 }
 0x1ea   :  { %v302_v44 = vadd.f32 %v600_v43, %v217_v42 }
 0x1eb   :  { %v296_v46 = vpop.f32.mrf.mxu1 }
 0x1ec   :  { %v527_v47 = vmul.f32 -1.442695, %v302_v44  ;;  %v297_v48 = vadd.f32 %v296_v46, %v212_v45 }
 0x1ee   :  { %627 = vpow2.f32 %v527_v47  ;;  %v526_v49 = vmul.f32 -1.442695, %v297_v48 }
 0x1f0   :  { %629 = vpow2.f32 %v526_v49 }
 0x1fb   :  { %v628_v50 = vpop.eup %627 }
 0x1fc   :  { %v312_v51 = vadd.f32 1.0, %v628_v50 }
 0x1fd   :  { %v630_v52 = vpop.eup %629 }
 0x1fe   :  { %631 = vrcp.f32 %v312_v51  ;;  %v311_v53 = vadd.f32 1.0, %v630_v52 }
 0x200   :  { %633 = vrcp.f32 %v311_v53 }
 0x20b   :  { %v632_v54 = vpop.eup %631 }
 0x20c   :  { %602 = vmatpush3.msk.msra.mxu1 %vm328_vm4, %v632_v54 }
 0x20d   :  { %v634_v56 = vpop.eup %633  ;;  %603 = vmatprep.subr.mxu1 %v658_v41 }
 0x20e   :  { %604 = vmatpush3.msra.mxu1 %v634_v56 }
 0x20f   :  { %606 = vmatmul.mubr.msk.f32.vlgmr.msra.gmra.mxu1 %vm324_vm5, %v317_v55  ;;  %608 = vmatprep.subr.mxu1 %v658_v41 }
 0x210   :  { %610 = vmatprep.mubr.msk.f32.mxu1 %vm659_vm3, %v658_v41 }
 0x2cf   :  { %v398_v58 = vpop.f32.mrf.mxu1 }
 0x2d0   :  { %v399_v59 = vadd.f32 %v398_v58, %v322_v57 }
 0x2d1   :  { %v607_v60 = vpop.f32.mrf.mxu1 }
 0x2d2   :  { %v402_v61 = vmax.f32 %v399_v59, 0.0 }
 0x2d4   :  { %609 = vmatpush3.msk.msra.mxu1 %vm414_vm6, %v402_v61 }
 0x2d5   :  { %611 = vmatmul.mubr.msk.f32.vlgmr.msra.gmra.mxu1 %vm410_vm7, %v403_v62 }
 0x395   :  { %v484_v0 = vpop.f32.mrf.mxu1 }
 0x396   :  { %v485_v1 = vadd.f32 %v484_v0, %v408_v63 }
 0x397   :  { %v612_v2 = vpop.f32.mrf.mxu1 }
 0x398   :  { %488 = vst [vmem:[#allocation2] sm:$0xf] %v485_v1 }
 0x399   :  { %646 = shalt.err (!%p643_p4)
}
 0x39a   :  { %498 = dma.vmem_to_hbm [thread:$0]  %s496_s14, 64, %s845_s9, [#allocation3]  }
 0x39b   :  { %655 = dma.done.wait [#allocation3], 64  }
 0x39c   :  { %656 = vsyncadd [#allocation3], 4294967232 }
 0x39d   :  { %502 = vsyncpa [#allocation3], 1 }

</bundles_post_ra>
